<compile_context>
chip_gen: v6e
topology: v6e:2x2x1
jax: 0.10.0
libtpu: 0.0.40
codegen_flags: <defaults>
</compile_context>

<pallas_src>
import functools

import jax
import jax.numpy as jnp
from jax.experimental import pallas as pl
from jax.experimental.pallas import tpu as pltpu


def _round_up(x, m):
    return ((x + m - 1) // m) * m


def _cdiv(a, b):
    return -(-a // b)


# ----------------------------- fused Pallas kernel ---------------------------

def _mlp_fused_kernel(*refs, n_layers: int):
    """Fused MLP: x @ W0 + b0 -> ReLU -> ... -> x @ W_last + b_last.

    refs layout (all VMEM blocks):
      refs[0]        : x    (tm, In)
      refs[1 + 2*i]  : W_i  (d_i_pad, d_{i+1}_pad)   (compute dtype)
      refs[2 + 2*i]  : b_i  (1, d_{i+1}_pad)
      refs[-1]       : out  (tm, out_pad)

    Matmuls run in the operands' native dtype (bf16 hits the full MXU rate) with f32
    accumulation via preferred_element_type; the running activation is cast back to the
    compute dtype between layers. Dropout is identity in eval mode.
    """
    x_ref = refs[0]
    o_ref = refs[-1]
    h = x_ref[...]
    for i in range(n_layers):
        w = refs[1 + 2 * i][...]
        b = refs[2 + 2 * i][...]
        acc = jnp.dot(h, w, preferred_element_type=jnp.float32)
        acc = acc + b.astype(jnp.float32)
        if i != n_layers - 1:
            acc = jnp.maximum(acc, 0.0)     # ReLU; dropout(0.2) is identity in eval
            h = acc.astype(w.dtype)         # back to compute dtype for next MXU pass
        else:
            o_ref[...] = acc.astype(o_ref.dtype)


# ------------------------------- tiling helpers -------------------------------

def _pick_batch_tile(b_pad, row_bytes):
    """Rows per batch tile: multiple of 8; >=2 tiles when b_pad >= 16 so both v7x
    TensorCores get work; capped at 512 rows and ~8 MiB of double-buffered I/O."""
    cap = min(512, max(8, ((8 << 20) // max(2 * row_bytes, 1)) // 8 * 8))
    if b_pad < 16:
        return min(b_pad, cap)
    n_tiles = max(2, _cdiv(b_pad, cap))
    return min(cap, _round_up(_cdiv(b_pad, n_tiles), 8))


# ------------------------------ fused MLP wrapper ------------------------------

def mlp_fused_pallas(x2d, params, *, compute_dtype=None):
    """Run the whole MLP in one pallas_call.  x2d: (B, In)."""
    out_dtype = x2d.dtype
    n_layers = len(params)
    out_dim = params[-1][0].shape[1]

    # Optional mixed-precision path: cast once in the wrapper; the kernel relies on
    # preferred_element_type=f32 for accumulation (MXU-native bf16 matmuls).
    if compute_dtype is not None and compute_dtype != x2d.dtype:
        x2d = x2d.astype(compute_dtype)
        params = [(w.astype(compute_dtype), b.astype(compute_dtype)) for (w, b) in params]

    B, In = x2d.shape

    # --- lane-pad every layer width to a multiple of 128 (unmasked vregs/stores).
    # Zero cols + zero bias -> ReLU(0)=0 -> zero rows in the next weight: exact math.
    padded = []
    prev_width = In                      # input columns stay unpadded (full-dim block)
    for (w, b) in params:
        d_in, d_out = w.shape
        d_out_p = _round_up(d_out, 128)
        w_p = jnp.pad(w, ((0, prev_width - d_in), (0, d_out_p - d_out)))
        b_p = jnp.pad(b, ((0, d_out_p - d_out),)).reshape(1, d_out_p)
        padded.append((w_p, b_p))
        prev_width = d_out_p
    out_pad = prev_width

    # --- batch tiling: choose tm, then pad rows to a multiple of tm.
    in_itemsize = jnp.zeros((), x2d.dtype).dtype.itemsize
    out_itemsize = jnp.zeros((), out_dtype).dtype.itemsize
    row_bytes = In * in_itemsize + out_pad * out_itemsize
    tm = _pick_batch_tile(_round_up(B, 8), row_bytes)
    B_pad = _round_up(B, tm)
    x_p = jnp.pad(x2d, ((0, B_pad - B), (0, 0))) if B_pad != B else x2d
    grid = (B_pad // tm,)

    flat_inputs = [x_p]
    for (w_p, b_p) in padded:
        flat_inputs += [w_p, b_p]

    # VMEM / cost bookkeeping (padded shapes).
    weight_bytes = sum(w.size * w.dtype.itemsize + b.size * b.dtype.itemsize
                       for (w, b) in padded)
    io_tile_bytes = 2 * tm * In * in_itemsize + 2 * tm * out_pad * out_itemsize
    scratch_bytes = 2 * tm * max(w.shape[1] for (w, _) in padded) * 4   # f32 intermediates
    flops = sum(2 * B_pad * w.shape[0] * w.shape[1] for (w, _) in padded)
    bytes_accessed = (x_p.size * in_itemsize + weight_bytes
                      + B_pad * out_pad * out_itemsize)

    kernel = functools.partial(_mlp_fused_kernel, n_layers=n_layers)

    def run(single_buffer_weights):
        # Weights/biases use a constant index_map (resident across batch tiles):
        # single-buffering them halves the dominant VMEM consumer (key on v7x 64 MiB).
        wb_kwargs = dict(pipeline_mode=pl.Buffered(1)) if single_buffer_weights else {}
        in_specs = [pl.BlockSpec((tm, In), lambda i: (i, 0))]
        for (w_p, b_p) in padded:
            d_in_p, d_out_p = w_p.shape
            in_specs.append(pl.BlockSpec((d_in_p, d_out_p), lambda i: (0, 0), **wb_kwargs))
            in_specs.append(pl.BlockSpec((1, d_out_p), lambda i: (0, 0), **wb_kwargs))

        n_buf = 1 if single_buffer_weights else 2
        vmem_needed = n_buf * weight_bytes + io_tile_bytes + scratch_bytes
        vmem_limit = min(max(int(vmem_needed * 1.25) + (1 << 20), 32 << 20), 112 << 20)
        # TODO(synk): when vmem_needed exceeds ~48 MiB (v7x has only 64 MiB physical
        # VMEM), fall back to inner K/N tiling of the large layers (pltpu.emit_pipeline
        # over weight chunks, N tiles of 256 on v6e/v7x, 128 on v5e) instead of keeping
        # the full weight set resident.

        return pl.pallas_call(
            kernel,
            out_shape=jax.ShapeDtypeStruct((B_pad, out_pad), out_dtype),
            grid=grid,
            in_specs=in_specs,
            out_specs=pl.BlockSpec((tm, out_pad), lambda i: (i, 0)),
            compiler_params=pltpu.CompilerParams(
                dimension_semantics=("parallel",),   # batch tiles split across v7x's 2 TCs
                vmem_limit_bytes=vmem_limit),
            cost_estimate=pl.CostEstimate(
                flops=flops, transcendentals=0, bytes_accessed=bytes_accessed),
        )(*flat_inputs)

    try:
        out_padded = run(single_buffer_weights=True)
    except Exception:
        # pipeline_mode=pl.Buffered(1) unsupported on this jax build -> default 2 buffers.
        out_padded = run(single_buffer_weights=False)

    return out_padded[:B, :out_dim]


# ----------------------------- MLPModel wrapper ------------------------------

def init_mlp_params(key, input_dim, output_dim, hidden_dims):
    """Deterministic init matching nn.Linear's default (uniform +/- 1/sqrt(fan_in))."""
    if hidden_dims is None:
        hidden_dims = []
    elif isinstance(hidden_dims, int):
        hidden_dims = [hidden_dims]
    dims = [input_dim] + list(hidden_dims) + [output_dim]
    params = []
    for i in range(len(dims) - 1):
        fan_in, fan_out = dims[i], dims[i + 1]
        key, kw, kb = jax.random.split(key, 3)
        bound = 1.0 / (fan_in ** 0.5)
        w = jax.random.uniform(kw, (fan_in, fan_out), jnp.float32, -bound, bound)
        b = jax.random.uniform(kb, (fan_out,), jnp.float32, -bound, bound)
        params.append((w, b))
    return params


def mlp_model_forward(x, mask, params, *, flatten=True, compute_dtype=None):
    """Equivalent of MLPModel.forward(input, mask) in eval mode."""
    if flatten:
        x = x.reshape(x.shape[0], -1)       # torch .view(B, -1) on NCHW
    out = mlp_fused_pallas(x, params, compute_dtype=compute_dtype)
    return out, mask


# ----------------------------------- main ------------------------------------

if __name__ == "__main__":
    key = jax.random.PRNGKey(0)
    k_x, k_m, k_p = jax.random.split(key, 3)

    # Small shapes consistent with the module: NCHW input flattened to (B, C*H*W).
    B, C, H, W = 2, 4, 4, 4          # input_dim = 4*4*4 = 64
    input_dim = C * H * W
    hidden_dims = [32]
    output_dim = 16

    x = jax.random.normal(k_x, (B, C, H, W), jnp.float32)
    mask = jax.random.bernoulli(k_m, 0.5, (B, output_dim)).astype(jnp.float32)
    params = init_mlp_params(k_p, input_dim, output_dim, hidden_dims)

    # Pure-JAX reference (eval mode: dropout = identity).
    xr = x.reshape(B, -1)
    ref = xr
    for i, (w, b) in enumerate(params):
        ref = ref @ w + b
        if i != len(params) - 1:
            ref = jnp.maximum(ref, 0.0)

    # f32 path (tight check against the reference).
    out, mask_out = mlp_model_forward(x, mask, params, flatten=True)
    jax.block_until_ready(out)
    jax.block_until_ready(mask_out)
    assert out.shape == (B, output_dim), out.shape
    assert mask_out.shape == mask.shape
    assert jnp.allclose(out, ref, atol=1e-5, rtol=1e-5)

    # bf16 compute path (MXU-native matmuls, f32 accumulation) — loose tolerance.
    out_bf16, _ = mlp_model_forward(x, mask, params, flatten=True,
                                    compute_dtype=jnp.bfloat16)
    jax.block_until_ready(out_bf16)
    assert out_bf16.shape == (B, output_dim), out_bf16.shape
    assert jnp.allclose(out_bf16.astype(jnp.float32), ref, atol=1e-1, rtol=5e-2)

    print("KERNEL_OK")
</pallas_src>

<mosaic_0001>
module attributes {stable_mosaic.version = 11 : i64} {
  func.func @_mlp_fused_kernel(%arg0: i32, %arg1: memref<8x64xf32, #tpu.memory_space<vmem>>, %arg2: memref<64x128xf32, #tpu.memory_space<vmem>>, %arg3: memref<1x128xf32, #tpu.memory_space<vmem>>, %arg4: memref<128x128xf32, #tpu.memory_space<vmem>>, %arg5: memref<1x128xf32, #tpu.memory_space<vmem>>, %arg6: memref<8x128xf32, #tpu.memory_space<vmem>>) attributes {dimension_semantics = [#tpu.dimension_semantics<parallel>], iteration_bounds = array<i64: 1>, scalar_prefetch = 0 : i64, scratch_operands = 0 : i64, tpu.core_type = #tpu.core_type<tc>, window_params = [{transform_indices = @transform_0, window_bounds = array<i64: 8, 64>}, {pipeline_mode = #tpu.pipeline_mode<synchronous>, transform_indices = @transform_1, window_bounds = array<i64: 64, 128>}, {pipeline_mode = #tpu.pipeline_mode<synchronous>, transform_indices = @transform_2, window_bounds = array<i64: 1, 128>}, {pipeline_mode = #tpu.pipeline_mode<synchronous>, transform_indices = @transform_3, window_bounds = array<i64: 128, 128>}, {pipeline_mode = #tpu.pipeline_mode<synchronous>, transform_indices = @transform_4, window_bounds = array<i64: 1, 128>}, {transform_indices = @transform_5, window_bounds = array<i64: 8, 128>}]} {
    %c0 = arith.constant 0 : index
    %c0_0 = arith.constant 0 : index
    %0 = vector.load %arg1[%c0, %c0_0] : memref<8x64xf32, #tpu.memory_space<vmem>>, vector<8x64xf32>
    %c0_1 = arith.constant 0 : index
    %c0_2 = arith.constant 0 : index
    %1 = vector.load %arg2[%c0_1, %c0_2] : memref<64x128xf32, #tpu.memory_space<vmem>>, vector<64x128xf32>
    %c0_3 = arith.constant 0 : index
    %c0_4 = arith.constant 0 : index
    %2 = vector.load %arg3[%c0_3, %c0_4] : memref<1x128xf32, #tpu.memory_space<vmem>>, vector<1x128xf32>
    %cst = arith.constant dense<0.000000e+00> : vector<8x128xf32>
    %3 = tpu.matmul %0, %1, %cst {dimension_numbers = #tpu.dot_dimension_numbers<[1], [0], [0], [1], [0, 0, 1, 1], [], []>} : vector<8x64xf32>, vector<64x128xf32>, vector<8x128xf32> -> vector<8x128xf32>
    %4 = vector.broadcast %2 : vector<1x128xf32> to vector<8x128xf32>
    %5 = arith.addf %3, %4 : vector<8x128xf32>
    %cst_5 = arith.constant 0.000000e+00 : f32
    %6 = vector.broadcast %cst_5 : f32 to vector<8x128xf32>
    %7 = arith.maximumf %5, %6 : vector<8x128xf32>
    %c0_6 = arith.constant 0 : index
    %c0_7 = arith.constant 0 : index
    %8 = vector.load %arg4[%c0_6, %c0_7] : memref<128x128xf32, #tpu.memory_space<vmem>>, vector<128x128xf32>
    %c0_8 = arith.constant 0 : index
    %c0_9 = arith.constant 0 : index
    %9 = vector.load %arg5[%c0_8, %c0_9] : memref<1x128xf32, #tpu.memory_space<vmem>>, vector<1x128xf32>
    %cst_10 = arith.constant dense<0.000000e+00> : vector<8x128xf32>
    %10 = tpu.matmul %7, %8, %cst_10 {dimension_numbers = #tpu.dot_dimension_numbers<[1], [0], [0], [1], [0, 0, 1, 1], [], []>} : vector<8x128xf32>, vector<128x128xf32>, vector<8x128xf32> -> vector<8x128xf32>
    %11 = vector.broadcast %9 : vector<1x128xf32> to vector<8x128xf32>
    %12 = arith.addf %10, %11 : vector<8x128xf32>
    %c0_11 = arith.constant 0 : index
    %c0_12 = arith.constant 0 : index
    %13 = vector.load %arg6[%c0_11, %c0_12] : memref<8x128xf32, #tpu.memory_space<vmem>>, vector<8x128xf32>
    tpu.vector_store %arg6[%c0_11, %c0_12], %12 {strides = array<i32>} : memref<8x128xf32, #tpu.memory_space<vmem>>, vector<8x128xf32>,
    return
  }
  func.func @transform_0(%arg0: i32) -> (i32, i32) {
    %c0_i32 = arith.constant 0 : i32
    %c0_i32_0 = arith.constant 0 : i32
    return %arg0, %c0_i32 : i32, i32
  }
  func.func @transform_1(%arg0: i32) -> (i32, i32) {
    %c0_i32 = arith.constant 0 : i32
    %c0_i32_0 = arith.constant 0 : i32
    %c0_i32_1 = arith.constant 0 : i32
    return %c0_i32, %c0_i32_0 : i32, i32
  }
  func.func @transform_2(%arg0: i32) -> (i32, i32) {
    %c0_i32 = arith.constant 0 : i32
    %c0_i32_0 = arith.constant 0 : i32
    %c0_i32_1 = arith.constant 0 : i32
    return %c0_i32, %c0_i32_0 : i32, i32
  }
  func.func @transform_3(%arg0: i32) -> (i32, i32) {
    %c0_i32 = arith.constant 0 : i32
    %c0_i32_0 = arith.constant 0 : i32
    %c0_i32_1 = arith.constant 0 : i32
    return %c0_i32, %c0_i32_0 : i32, i32
  }
  func.func @transform_4(%arg0: i32) -> (i32, i32) {
    %c0_i32 = arith.constant 0 : i32
    %c0_i32_0 = arith.constant 0 : i32
    %c0_i32_1 = arith.constant 0 : i32
    return %c0_i32, %c0_i32_0 : i32, i32
  }
  func.func @transform_5(%arg0: i32) -> (i32, i32) {
    %c0_i32 = arith.constant 0 : i32
    %c0_i32_0 = arith.constant 0 : i32
    return %arg0, %c0_i32 : i32, i32
  }
}

module attributes {stable_mosaic.version = 11 : i64} {
  func.func @_mlp_fused_kernel(%arg0: i32, %arg1: memref<8x64xf32, #tpu.memory_space<vmem>>, %arg2: memref<64x128xf32, #tpu.memory_space<vmem>>, %arg3: memref<1x128xf32, #tpu.memory_space<vmem>>, %arg4: memref<128x128xf32, #tpu.memory_space<vmem>>, %arg5: memref<1x128xf32, #tpu.memory_space<vmem>>, %arg6: memref<8x128xf32, #tpu.memory_space<vmem>>) attributes {dimension_semantics = [#tpu.dimension_semantics<parallel>], iteration_bounds = array<i64: 1>, scalar_prefetch = 0 : i64, scratch_operands = 0 : i64, tpu.core_type = #tpu.core_type<tc>, window_params = [{transform_indices = @transform_0, window_bounds = array<i64: 8, 64>}, {pipeline_mode = #tpu.pipeline_mode<synchronous>, transform_indices = @transform_1, window_bounds = array<i64: 64, 128>}, {pipeline_mode = #tpu.pipeline_mode<synchronous>, transform_indices = @transform_2, window_bounds = array<i64: 1, 128>}, {pipeline_mode = #tpu.pipeline_mode<synchronous>, transform_indices = @transform_3, window_bounds = array<i64: 128, 128>}, {pipeline_mode = #tpu.pipeline_mode<synchronous>, transform_indices = @transform_4, window_bounds = array<i64: 1, 128>}, {transform_indices = @transform_5, window_bounds = array<i64: 8, 128>}]} {
    %c0 = arith.constant 0 : index
    %c0_0 = arith.constant 0 : index
    %0 = vector.load %arg1[%c0, %c0_0] : memref<8x64xf32, #tpu.memory_space<vmem>>, vector<8x64xf32>
    %c0_1 = arith.constant 0 : index
    %c0_2 = arith.constant 0 : index
    %1 = vector.load %arg2[%c0_1, %c0_2] : memref<64x128xf32, #tpu.memory_space<vmem>>, vector<64x128xf32>
    %c0_3 = arith.constant 0 : index
    %c0_4 = arith.constant 0 : index
    %2 = vector.load %arg3[%c0_3, %c0_4] : memref<1x128xf32, #tpu.memory_space<vmem>>, vector<1x128xf32>
    %cst = arith.constant dense<0.000000e+00> : vector<8x128xf32>
    %3 = tpu.matmul %0, %1, %cst {dimension_numbers = #tpu.dot_dimension_numbers<[1], [0], [0], [1], [0, 0, 1, 1], [], []>} : vector<8x64xf32>, vector<64x128xf32>, vector<8x128xf32> -> vector<8x128xf32>
    %4 = vector.broadcast %2 : vector<1x128xf32> to vector<8x128xf32>
    %5 = arith.addf %3, %4 : vector<8x128xf32>
    %cst_5 = arith.constant 0.000000e+00 : f32
    %6 = vector.broadcast %cst_5 : f32 to vector<8x128xf32>
    %7 = arith.maximumf %5, %6 : vector<8x128xf32>
    %c0_6 = arith.constant 0 : index
    %c0_7 = arith.constant 0 : index
    %8 = vector.load %arg4[%c0_6, %c0_7] : memref<128x128xf32, #tpu.memory_space<vmem>>, vector<128x128xf32>
    %c0_8 = arith.constant 0 : index
    %c0_9 = arith.constant 0 : index
    %9 = vector.load %arg5[%c0_8, %c0_9] : memref<1x128xf32, #tpu.memory_space<vmem>>, vector<1x128xf32>
    %cst_10 = arith.constant dense<0.000000e+00> : vector<8x128xf32>
    %10 = tpu.matmul %7, %8, %cst_10 {dimension_numbers = #tpu.dot_dimension_numbers<[1], [0], [0], [1], [0, 0, 1, 1], [], []>} : vector<8x128xf32>, vector<128x128xf32>, vector<8x128xf32> -> vector<8x128xf32>
    %11 = vector.broadcast %9 : vector<1x128xf32> to vector<8x128xf32>
    %12 = arith.addf %10, %11 : vector<8x128xf32>
    %c0_11 = arith.constant 0 : index
    %c0_12 = arith.constant 0 : index
    %13 = vector.load %arg6[%c0_11, %c0_12] : memref<8x128xf32, #tpu.memory_space<vmem>>, vector<8x128xf32>
    tpu.vector_store %arg6[%c0_11, %c0_12], %12 {strides = array<i32>} : memref<8x128xf32, #tpu.memory_space<vmem>>, vector<8x128xf32>,
    return
  }
  func.func @transform_0(%arg0: i32) -> (i32, i32) {
    %c0_i32 = arith.constant 0 : i32
    %c0_i32_0 = arith.constant 0 : i32
    return %arg0, %c0_i32 : i32, i32
  }
  func.func @transform_1(%arg0: i32) -> (i32, i32) {
    %c0_i32 = arith.constant 0 : i32
    %c0_i32_0 = arith.constant 0 : i32
    %c0_i32_1 = arith.constant 0 : i32
    return %c0_i32, %c0_i32_0 : i32, i32
  }
  func.func @transform_2(%arg0: i32) -> (i32, i32) {
    %c0_i32 = arith.constant 0 : i32
    %c0_i32_0 = arith.constant 0 : i32
    %c0_i32_1 = arith.constant 0 : i32
    return %c0_i32, %c0_i32_0 : i32, i32
  }
  func.func @transform_3(%arg0: i32) -> (i32, i32) {
    %c0_i32 = arith.constant 0 : i32
    %c0_i32_0 = arith.constant 0 : i32
    %c0_i32_1 = arith.constant 0 : i32
    return %c0_i32, %c0_i32_0 : i32, i32
  }
  func.func @transform_4(%arg0: i32) -> (i32, i32) {
    %c0_i32 = arith.constant 0 : i32
    %c0_i32_0 = arith.constant 0 : i32
    %c0_i32_1 = arith.constant 0 : i32
    return %c0_i32, %c0_i32_0 : i32, i32
  }
  func.func @transform_5(%arg0: i32) -> (i32, i32) {
    %c0_i32 = arith.constant 0 : i32
    %c0_i32_0 = arith.constant 0 : i32
    return %arg0, %c0_i32 : i32, i32
  }
}

</mosaic_0001>

<bundles_post_ra>
// kernel: tpu_custom_call.1
= control target key start
LH: loop header
LB: loop body
LE: loop exit
PB: predicated region body
PF: predicated region fallthrough
CT: control target
= control target key end

     0   :  { %10 = vsyncpa [#allocation3], 0  ;;  %s520_s0 = inlined_call_operand.hbm [shape: f32[8,64], index: 0, kind: input, shape index: {}]   ;;  %s521_s1 = inlined_call_operand.hbm [shape: f32[64,128], index: 1, kind: input, shape index: {}]   ;;  %s522_s2 = inlined_call_operand.vmem [shape: f32[1,128], index: 2, kind: input, shape index: {}]   ;;  %s523_s3 = inlined_call_operand.hbm [shape: f32[128,128], index: 3, kind: input, shape index: {}]   ;;  %s524_s4 = inlined_call_operand.vmem [shape: f32[1,128], index: 4, kind: input, shape index: {}]   ;;  %s525_s5 = inlined_call_operand.hbm [shape: f32[8,128], index: 5, kind: output, shape index: {}]  }
   0x1   :  { %11 = vsyncpa [#allocation6], 0 }
   0x2   :  { %12 = vsyncpa [#allocation4], 0  ;;  %s438_s18 = smov [#allocation5]  }
   0x3   :  { %s28_s19 = sshll.u32 %s438_s18, 4  ;;  %s29_s19 = int_to_ptr.vmem [resolvable:$true] %s28_s19 }
   0x4   :  { %s360_s20 = scalar_lea.vmem %s29_s19, 1024  ;;  %p365_p1 = scmp.lt.s32.totalorder %s29_s19, %s29_s19 }
   0x5   :  { %p361_p0 = scmp.ne.s32.totalorder %s29_s19, %s360_s20  ;;  %p366_p2 = scmp.lt.s32.totalorder %s360_s20, %s360_s20 }
   0x7   :  { %p367_p3 = por %p366_p2, %p365_p1 }
   0x9   :  { %p368_p4 = pnand %p367_p3, %p361_p0 }
   0xb   :  { %371 = shalt.err (!%p368_p4)
}
   0xc   :  { %s439_s21 = smov 128   ;;  %s440_s22 = smov 8  }
   0xd   :  { %34 = dma.hbm_to_vmem [thread:$0]  %s521_s1, 1024, %s29_s19, [#allocation6], %s439_s21, %s439_s21, %s440_s22  }
   0xe   :  { %s441_s25 = smov [#allocation2]   ;;  %s442_s27 = smov [#allocation7]  }
   0xf   :  { %s19_s26 = sshll.u32 %s441_s25, 4  ;;  %s42_s28 = sshll.u32 %s442_s27, 4  ;;  %s20_s26 = int_to_ptr.vmem [resolvable:$true] %s19_s26  ;;  %s43_s28 = int_to_ptr.vmem [resolvable:$true] %s42_s28 }
  0x10   :  { %s380_s29 = scalar_lea.vmem %s20_s26, 128  ;;  %p385_p6 = scmp.lt.s32.totalorder %s20_s26, %s20_s26 }
  0x11   :  { %p381_p5 = scmp.ne.s32.totalorder %s20_s26, %s380_s29  ;;  %p386_p7 = scmp.lt.s32.totalorder %s380_s29, %s380_s29 }
  0x13   :  { %p387_p8 = por %p386_p7, %p385_p6 }
  0x15   :  { %p388_p9 = pnand %p387_p8, %p381_p5 }
  0x17   :  { %391 = shalt.err (!%p388_p9)
}
  0x18   :  { %22 = dma.hbm_to_vmem [thread:$0]  %s520_s0, 128, %s20_s26, [#allocation3]  }
  0x19   :  { %s400_s7 = scalar_lea.vmem %s43_s28, 2048  ;;  %p405_p11 = scmp.lt.s32.totalorder %s43_s28, %s43_s28 }
  0x1a   :  { %p401_p10 = scmp.ne.s32.totalorder %s43_s28, %s400_s7  ;;  %p406_p12 = scmp.lt.s32.totalorder %s400_s7, %s400_s7 }
  0x1c   :  { %p407_p13 = por %p406_p12, %p405_p11 }
  0x1e   :  { %p408_p0 = pnand %p407_p13, %p401_p10 }
  0x20   :  { %411 = shalt.err (!%p408_p0)
}
  0x21   :  { %48 = dma.hbm_to_vmem [thread:$0]  %s523_s3, 2048, %s43_s28, [#allocation6], %s439_s21, %s439_s21, %s440_s22  }
  0x22   :  { %432 = dma.done.wait [#allocation3], 128  }
  0x23   :  { %433 = vsyncadd [#allocation3], 4294967168 }
  0x24   :  { %434 = dma.done.wait [#allocation6], 3072  }
  0x25   :  { %435 = vsyncadd [#allocation6], 4294964224  ;;  %v443_v0 = vmov 0.0   ;;  %vm444_vm0 = vmmov 0   ;;  %v68_v1 = vld [vmem:[#allocation5 + $0x38] sm:$0xff]  ;;  %v67_v2 = vld [vmem:[#allocation5 + $0x30] sm:$0xff] }
  0x26   :  { %290 = vmatprep.subr.mxu0 %v443_v0  ;;  %306 = vmatprep.mubr.msk.f32.mxu0 %vm444_vm0, %v443_v0  ;;  %v66_v3 = vld [vmem:[#allocation5 + $0x28] sm:$0xff]  ;;  %v166_v4 = vld [vmem:[#allocation7 + $0x78] sm:$0xff]  ;;  %v165_v5 = vld [vmem:[#allocation7 + $0x70] sm:$0xff]  ;;  %vm76_vm1 = vcmask 523264   ;;  %s445_s11 = smov [#allocation8]  }
  0x27   :  { %309 = vmatprep.subr.mxu1 %v443_v0  ;;  %341 = vmatprep.mubr.msk.f32.mxu1 %vm444_vm0, %v443_v0  ;;  %v65_v6 = vld [vmem:[#allocation5 + $0x20] sm:$0xff]  ;;  %v164_v7 = vld [vmem:[#allocation7 + $0x68] sm:$0xff]  ;;  %v64_v8 = vld [vmem:[#allocation5 + $0x18] sm:$0xff]  ;;  %s251_s12 = sshll.u32 %s445_s11, 4  ;;  %s252_s12 = int_to_ptr.vmem [resolvable:$true] %s251_s12 }
  0x28   :  { %291 = vmatpush3.msra.mxu0 %v68_v1  ;;  %310 = vmatpush3.msra.mxu1 %v166_v4  ;;  %v163_v9 = vld [vmem:[#allocation7 + $0x60] sm:$0xff]  ;;  %v63_v10 = vld [vmem:[#allocation5 + $0x10] sm:$0xff]  ;;  %v162_v11 = vld [vmem:[#allocation7 + $0x58] sm:$0xff]  ;;  %s412_s13 = scalar_lea.vmem %s252_s12, 128  ;;  %p417_p2 = scmp.lt.s32.totalorder %s252_s12, %s252_s12 }
  0x29   :  { %292 = vmatprep.subr.mxu0 %v443_v0  ;;  %311 = vmatprep.subr.mxu1 %v443_v0  ;;  %v62_v12 = vld [vmem:[#allocation5 + $0x8] sm:$0xff]  ;;  %v161_v13 = vld [vmem:[#allocation7 + $0x50] sm:$0xff]  ;;  %v61_v14 = vld [vmem:[#allocation5] sm:$0xff]  ;;  %p413_p1 = scmp.ne.s32.totalorder %s252_s12, %s412_s13  ;;  %p418_p3 = scmp.lt.s32.totalorder %s412_s13, %s412_s13 }
  0x2a   :  { %293 = vmatpush3.msra.mxu0 %v67_v2  ;;  %312 = vmatpush3.msra.mxu1 %v165_v5  ;;  %v60_v15 = vld [vmem:[#allocation2] sm:$0xff]  ;;  %v160_v16 = vld [vmem:[#allocation7 + $0x48] sm:$0xff]  ;;  %v159_v17 = vld [vmem:[#allocation7 + $0x40] sm:$0xff] }
  0x2b   :  { %294 = vmatprep.subr.mxu0 %v443_v0  ;;  %313 = vmatprep.subr.mxu1 %v443_v0  ;;  %v158_v18 = vld [vmem:[#allocation7 + $0x38] sm:$0xff]  ;;  %v157_v19 = vld [vmem:[#allocation7 + $0x30] sm:$0xff]  ;;  %v156_v20 = vld [vmem:[#allocation7 + $0x28] sm:$0xff]  ;;  %p419_p4 = por %p418_p3, %p417_p2 }
  0x2c   :  { %295 = vmatpush3.msra.mxu0 %v66_v3  ;;  %314 = vmatpush3.msra.mxu1 %v164_v7  ;;  %v155_v21 = vld [vmem:[#allocation7 + $0x20] sm:$0xff]  ;;  %v154_v22 = vld [vmem:[#allocation7 + $0x18] sm:$0xff]  ;;  %v153_v23 = vld [vmem:[#allocation7 + $0x10] sm:$0xff] }
  0x2d   :  { %296 = vmatprep.subr.mxu0 %v443_v0  ;;  %315 = vmatprep.subr.mxu1 %v443_v0  ;;  %v152_v24 = vld [vmem:[#allocation7 + $0x8] sm:$0xff]  ;;  %v151_v25 = vld [vmem:[#allocation7] sm:$0xff]  ;;  %v261_v26 = vld [vmem:[%s522_s2] ss:$0 sm:$0xff]  ;;  %p420_p5 = pnand %p419_p4, %p413_p1 }
  0x2e   :  { %297 = vmatpush3.msra.mxu0 %v65_v6  ;;  %316 = vmatpush3.msra.mxu1 %v163_v9  ;;  %v263_v31 = vld [vmem:[%s524_s4] ss:$0 sm:$0xff] }
  0x2f   :  { %298 = vmatprep.subr.mxu0 %v443_v0  ;;  %317 = vmatprep.subr.mxu1 %v443_v0 }
  0x30   :  { %299 = vmatpush3.msra.mxu0 %v64_v8  ;;  %318 = vmatpush3.msra.mxu1 %v162_v11 }
  0x31   :  { %300 = vmatprep.subr.mxu0 %v443_v0  ;;  %319 = vmatprep.subr.mxu1 %v443_v0 }
  0x32   :  { %301 = vmatpush3.msra.mxu0 %v63_v10  ;;  %320 = vmatpush3.msra.mxu1 %v161_v13 }
  0x33   :  { %302 = vmatprep.subr.mxu0 %v443_v0  ;;  %321 = vmatprep.subr.mxu1 %v443_v0 }
  0x34   :  { %303 = vmatpush3.msra.mxu0 %v62_v12  ;;  %322 = vmatpush3.msra.mxu1 %v160_v16 }
  0x35   :  { %304 = vmatprep.subr.mxu0 %v443_v0  ;;  %323 = vmatprep.subr.mxu1 %v443_v0 }
  0x36   :  { %305 = vmatpush3.msra.mxu0 %v61_v14  ;;  %324 = vmatpush3.msra.mxu1 %v159_v17 }
  0x37   :  { %307 = vmatmul.mubr.msk.f32.vlgmr.msra.gmra.mxu0 %vm76_vm1, %v60_v15  ;;  %325 = vmatprep.subr.mxu1 %v443_v0 }
  0x38   :  { %326 = vmatpush3.msra.mxu1 %v158_v18 }
  0x39   :  { %327 = vmatprep.subr.mxu1 %v443_v0 }
  0x3a   :  { %328 = vmatpush3.msra.mxu1 %v157_v19 }
  0x3b   :  { %329 = vmatprep.subr.mxu1 %v443_v0 }
  0x3c   :  { %330 = vmatpush3.msra.mxu1 %v156_v20 }
  0x3d   :  { %331 = vmatprep.subr.mxu1 %v443_v0 }
  0x3e   :  { %332 = vmatpush3.msra.mxu1 %v155_v21 }
  0x3f   :  { %333 = vmatprep.subr.mxu1 %v443_v0 }
  0x40   :  { %334 = vmatpush3.msra.mxu1 %v154_v22 }
  0x41   :  { %335 = vmatprep.subr.mxu1 %v443_v0 }
  0x42   :  { %336 = vmatpush3.msra.mxu1 %v153_v23 }
  0x43   :  { %337 = vmatprep.subr.mxu1 %v443_v0 }
  0x44   :  { %338 = vmatpush3.msra.mxu1 %v152_v24 }
  0x45   :  { %339 = vmatprep.subr.mxu1 %v443_v0 }
  0x46   :  { %340 = vmatpush3.msra.mxu1 %v151_v25 }
  0xf7   :  { %v146_v27 = vpop.f32.mrf.mxu0 }
  0xf8   :  { %v147_v28 = vadd.f32 %v261_v26, %v146_v27 }
  0xf9   :  { %v308_v29 = vpop.f32.mrf.mxu0 }
  0xfa   :  { %v150_v30 = vmax.f32 %v147_v28, 0.0 }
  0xfc   :  { %342 = vmatmul.mubr.f32.vlgmr.msra.gmra.mxu1 %v150_v30 }
 0x1bc   :  { %v240_v32 = vpop.f32.mrf.mxu1 }
 0x1bd   :  { %v241_v33 = vadd.f32 %v263_v31, %v240_v32 }
 0x1be   :  { %v343_v34 = vpop.f32.mrf.mxu1 }
 0x1bf   :  { %244 = vst [vmem:[#allocation8] sm:$0xff] %v241_v33 }
 0x1c0   :  { %423 = shalt.err (!%p420_p5)
}
 0x1c1   :  { %254 = dma.vmem_to_hbm [thread:$0]  %s252_s12, 128, %s525_s5, [#allocation4]  }
 0x1c2   :  { %436 = dma.done.wait [#allocation4], 128  }
 0x1c3   :  { %437 = vsyncadd [#allocation4], 4294967168 }
 0x1c4   :  { %258 = vsyncpa [#allocation3], 1 }
 0x1c5   :  { %259 = vsyncpa [#allocation6], 1 }
 0x1c6   :  { %260 = vsyncpa [#allocation4], 1 }

// kernel: tpu_custom_call.1
= control target key start
LH: loop header
LB: loop body
LE: loop exit
PB: predicated region body
PF: predicated region fallthrough
CT: control target
= control target key end

     0   :  { %10 = vsyncpa [#allocation3], 0  ;;  %s520_s0 = inlined_call_operand.hbm [shape: f32[8,64], index: 0, kind: input, shape index: {}]   ;;  %s521_s1 = inlined_call_operand.hbm [shape: f32[64,128], index: 1, kind: input, shape index: {}]   ;;  %s522_s2 = inlined_call_operand.vmem [shape: f32[1,128], index: 2, kind: input, shape index: {}]   ;;  %s523_s3 = inlined_call_operand.hbm [shape: f32[128,128], index: 3, kind: input, shape index: {}]   ;;  %s524_s4 = inlined_call_operand.vmem [shape: f32[1,128], index: 4, kind: input, shape index: {}]   ;;  %s525_s5 = inlined_call_operand.hbm [shape: f32[8,128], index: 5, kind: output, shape index: {}]  }
   0x1   :  { %11 = vsyncpa [#allocation6], 0 }
   0x2   :  { %12 = vsyncpa [#allocation4], 0  ;;  %s438_s18 = smov [#allocation5]  }
   0x3   :  { %s28_s19 = sshll.u32 %s438_s18, 4  ;;  %s29_s19 = int_to_ptr.vmem [resolvable:$true] %s28_s19 }
   0x4   :  { %s360_s20 = scalar_lea.vmem %s29_s19, 1024  ;;  %p365_p1 = scmp.lt.s32.totalorder %s29_s19, %s29_s19 }
   0x5   :  { %p361_p0 = scmp.ne.s32.totalorder %s29_s19, %s360_s20  ;;  %p366_p2 = scmp.lt.s32.totalorder %s360_s20, %s360_s20 }
   0x7   :  { %p367_p3 = por %p366_p2, %p365_p1 }
   0x9   :  { %p368_p4 = pnand %p367_p3, %p361_p0 }
   0xb   :  { %371 = shalt.err (!%p368_p4)
}
   0xc   :  { %s439_s21 = smov 128   ;;  %s440_s22 = smov 8  }
   0xd   :  { %34 = dma.hbm_to_vmem [thread:$0]  %s521_s1, 1024, %s29_s19, [#allocation6], %s439_s21, %s439_s21, %s440_s22  }
   0xe   :  { %s441_s25 = smov [#allocation2]   ;;  %s442_s27 = smov [#allocation7]  }
   0xf   :  { %s19_s26 = sshll.u32 %s441_s25, 4  ;;  %s42_s28 = sshll.u32 %s442_s27, 4  ;;  %s20_s26 = int_to_ptr.vmem [resolvable:$true] %s19_s26  ;;  %s43_s28 = int_to_ptr.vmem [resolvable:$true] %s42_s28 }
  0x10   :  { %s380_s29 = scalar_lea.vmem %s20_s26, 128  ;;  %p385_p6 = scmp.lt.s32.totalorder %s20_s26, %s20_s26 }
  0x11   :  { %p381_p5 = scmp.ne.s32.totalorder %s20_s26, %s380_s29  ;;  %p386_p7 = scmp.lt.s32.totalorder %s380_s29, %s380_s29 }
  0x13   :  { %p387_p8 = por %p386_p7, %p385_p6 }
  0x15   :  { %p388_p9 = pnand %p387_p8, %p381_p5 }
  0x17   :  { %391 = shalt.err (!%p388_p9)
}
  0x18   :  { %22 = dma.hbm_to_vmem [thread:$0]  %s520_s0, 128, %s20_s26, [#allocation3]  }
  0x19   :  { %s400_s7 = scalar_lea.vmem %s43_s28, 2048  ;;  %p405_p11 = scmp.lt.s32.totalorder %s43_s28, %s43_s28 }
  0x1a   :  { %p401_p10 = scmp.ne.s32.totalorder %s43_s28, %s400_s7  ;;  %p406_p12 = scmp.lt.s32.totalorder %s400_s7, %s400_s7 }
  0x1c   :  { %p407_p13 = por %p406_p12, %p405_p11 }
  0x1e   :  { %p408_p0 = pnand %p407_p13, %p401_p10 }
  0x20   :  { %411 = shalt.err (!%p408_p0)
}
  0x21   :  { %48 = dma.hbm_to_vmem [thread:$0]  %s523_s3, 2048, %s43_s28, [#allocation6], %s439_s21, %s439_s21, %s440_s22  }
  0x22   :  { %432 = dma.done.wait [#allocation3], 128  }
  0x23   :  { %433 = vsyncadd [#allocation3], 4294967168 }
  0x24   :  { %434 = dma.done.wait [#allocation6], 3072  }
  0x25   :  { %435 = vsyncadd [#allocation6], 4294964224  ;;  %v443_v0 = vmov 0.0   ;;  %vm444_vm0 = vmmov 0   ;;  %v68_v1 = vld [vmem:[#allocation5 + $0x38] sm:$0xff]  ;;  %v67_v2 = vld [vmem:[#allocation5 + $0x30] sm:$0xff] }
  0x26   :  { %290 = vmatprep.subr.mxu0 %v443_v0  ;;  %306 = vmatprep.mubr.msk.f32.mxu0 %vm444_vm0, %v443_v0  ;;  %v66_v3 = vld [vmem:[#allocation5 + $0x28] sm:$0xff]  ;;  %v166_v4 = vld [vmem:[#allocation7 + $0x78] sm:$0xff]  ;;  %v165_v5 = vld [vmem:[#allocation7 + $0x70] sm:$0xff]  ;;  %vm76_vm1 = vcmask 523264   ;;  %s445_s11 = smov [#allocation8]  }
  0x27   :  { %309 = vmatprep.subr.mxu1 %v443_v0  ;;  %341 = vmatprep.mubr.msk.f32.mxu1 %vm444_vm0, %v443_v0  ;;  %v65_v6 = vld [vmem:[#allocation5 + $0x20] sm:$0xff]  ;;  %v164_v7 = vld [vmem:[#allocation7 + $0x68] sm:$0xff]  ;;  %v64_v8 = vld [vmem:[#allocation5 + $0x18] sm:$0xff]  ;;  %s251_s12 = sshll.u32 %s445_s11, 4  ;;  %s252_s12 = int_to_ptr.vmem [resolvable:$true] %s251_s12 }
  0x28   :  { %291 = vmatpush3.msra.mxu0 %v68_v1  ;;  %310 = vmatpush3.msra.mxu1 %v166_v4  ;;  %v163_v9 = vld [vmem:[#allocation7 + $0x60] sm:$0xff]  ;;  %v63_v10 = vld [vmem:[#allocation5 + $0x10] sm:$0xff]  ;;  %v162_v11 = vld [vmem:[#allocation7 + $0x58] sm:$0xff]  ;;  %s412_s13 = scalar_lea.vmem %s252_s12, 128  ;;  %p417_p2 = scmp.lt.s32.totalorder %s252_s12, %s252_s12 }
  0x29   :  { %292 = vmatprep.subr.mxu0 %v443_v0  ;;  %311 = vmatprep.subr.mxu1 %v443_v0  ;;  %v62_v12 = vld [vmem:[#allocation5 + $0x8] sm:$0xff]  ;;  %v161_v13 = vld [vmem:[#allocation7 + $0x50] sm:$0xff]  ;;  %v61_v14 = vld [vmem:[#allocation5] sm:$0xff]  ;;  %p413_p1 = scmp.ne.s32.totalorder %s252_s12, %s412_s13  ;;  %p418_p3 = scmp.lt.s32.totalorder %s412_s13, %s412_s13 }
  0x2a   :  { %293 = vmatpush3.msra.mxu0 %v67_v2  ;;  %312 = vmatpush3.msra.mxu1 %v165_v5  ;;  %v60_v15 = vld [vmem:[#allocation2] sm:$0xff]  ;;  %v160_v16 = vld [vmem:[#allocation7 + $0x48] sm:$0xff]  ;;  %v159_v17 = vld [vmem:[#allocation7 + $0x40] sm:$0xff] }
  0x2b   :  { %294 = vmatprep.subr.mxu0 %v443_v0  ;;  %313 = vmatprep.subr.mxu1 %v443_v0  ;;  %v158_v18 = vld [vmem:[#allocation7 + $0x38] sm:$0xff]  ;;  %v157_v19 = vld [vmem:[#allocation7 + $0x30] sm:$0xff]  ;;  %v156_v20 = vld [vmem:[#allocation7 + $0x28] sm:$0xff]  ;;  %p419_p4 = por %p418_p3, %p417_p2 }
  0x2c   :  { %295 = vmatpush3.msra.mxu0 %v66_v3  ;;  %314 = vmatpush3.msra.mxu1 %v164_v7  ;;  %v155_v21 = vld [vmem:[#allocation7 + $0x20] sm:$0xff]  ;;  %v154_v22 = vld [vmem:[#allocation7 + $0x18] sm:$0xff]  ;;  %v153_v23 = vld [vmem:[#allocation7 + $0x10] sm:$0xff] }
  0x2d   :  { %296 = vmatprep.subr.mxu0 %v443_v0  ;;  %315 = vmatprep.subr.mxu1 %v443_v0  ;;  %v152_v24 = vld [vmem:[#allocation7 + $0x8] sm:$0xff]  ;;  %v151_v25 = vld [vmem:[#allocation7] sm:$0xff]  ;;  %v261_v26 = vld [vmem:[%s522_s2] ss:$0 sm:$0xff]  ;;  %p420_p5 = pnand %p419_p4, %p413_p1 }
  0x2e   :  { %297 = vmatpush3.msra.mxu0 %v65_v6  ;;  %316 = vmatpush3.msra.mxu1 %v163_v9  ;;  %v263_v31 = vld [vmem:[%s524_s4] ss:$0 sm:$0xff] }
  0x2f   :  { %298 = vmatprep.subr.mxu0 %v443_v0  ;;  %317 = vmatprep.subr.mxu1 %v443_v0 }
  0x30   :  { %299 = vmatpush3.msra.mxu0 %v64_v8  ;;  %318 = vmatpush3.msra.mxu1 %v162_v11 }
  0x31   :  { %300 = vmatprep.subr.mxu0 %v443_v0  ;;  %319 = vmatprep.subr.mxu1 %v443_v0 }
  0x32   :  { %301 = vmatpush3.msra.mxu0 %v63_v10  ;;  %320 = vmatpush3.msra.mxu1 %v161_v13 }
  0x33   :  { %302 = vmatprep.subr.mxu0 %v443_v0  ;;  %321 = vmatprep.subr.mxu1 %v443_v0 }
  0x34   :  { %303 = vmatpush3.msra.mxu0 %v62_v12  ;;  %322 = vmatpush3.msra.mxu1 %v160_v16 }
  0x35   :  { %304 = vmatprep.subr.mxu0 %v443_v0  ;;  %323 = vmatprep.subr.mxu1 %v443_v0 }
  0x36   :  { %305 = vmatpush3.msra.mxu0 %v61_v14  ;;  %324 = vmatpush3.msra.mxu1 %v159_v17 }
  0x37   :  { %307 = vmatmul.mubr.msk.f32.vlgmr.msra.gmra.mxu0 %vm76_vm1, %v60_v15  ;;  %325 = vmatprep.subr.mxu1 %v443_v0 }
  0x38   :  { %326 = vmatpush3.msra.mxu1 %v158_v18 }
  0x39   :  { %327 = vmatprep.subr.mxu1 %v443_v0 }
  0x3a   :  { %328 = vmatpush3.msra.mxu1 %v157_v19 }
  0x3b   :  { %329 = vmatprep.subr.mxu1 %v443_v0 }
  0x3c   :  { %330 = vmatpush3.msra.mxu1 %v156_v20 }
  0x3d   :  { %331 = vmatprep.subr.mxu1 %v443_v0 }
  0x3e   :  { %332 = vmatpush3.msra.mxu1 %v155_v21 }
  0x3f   :  { %333 = vmatprep.subr.mxu1 %v443_v0 }
  0x40   :  { %334 = vmatpush3.msra.mxu1 %v154_v22 }
  0x41   :  { %335 = vmatprep.subr.mxu1 %v443_v0 }
  0x42   :  { %336 = vmatpush3.msra.mxu1 %v153_v23 }
  0x43   :  { %337 = vmatprep.subr.mxu1 %v443_v0 }
  0x44   :  { %338 = vmatpush3.msra.mxu1 %v152_v24 }
  0x45   :  { %339 = vmatprep.subr.mxu1 %v443_v0 }
  0x46   :  { %340 = vmatpush3.msra.mxu1 %v151_v25 }
  0xf7   :  { %v146_v27 = vpop.f32.mrf.mxu0 }
  0xf8   :  { %v147_v28 = vadd.f32 %v261_v26, %v146_v27 }
  0xf9   :  { %v308_v29 = vpop.f32.mrf.mxu0 }
  0xfa   :  { %v150_v30 = vmax.f32 %v147_v28, 0.0 }
  0xfc   :  { %342 = vmatmul.mubr.f32.vlgmr.msra.gmra.mxu1 %v150_v30 }
 0x1bc   :  { %v240_v32 = vpop.f32.mrf.mxu1 }
 0x1bd   :  { %v241_v33 = vadd.f32 %v263_v31, %v240_v32 }
 0x1be   :  { %v343_v34 = vpop.f32.mrf.mxu1 }
 0x1bf   :  { %244 = vst [vmem:[#allocation8] sm:$0xff] %v241_v33 }
 0x1c0   :  { %423 = shalt.err (!%p420_p5)
}
 0x1c1   :  { %254 = dma.vmem_to_hbm [thread:$0]  %s252_s12, 128, %s525_s5, [#allocation4]  }
 0x1c2   :  { %436 = dma.done.wait [#allocation4], 128  }
 0x1c3   :  { %437 = vsyncadd [#allocation4], 4294967168 }
 0x1c4   :  { %258 = vsyncpa [#allocation3], 1 }
 0x1c5   :  { %259 = vsyncpa [#allocation6], 1 }
 0x1c6   :  { %260 = vsyncpa [#allocation4], 1 }

</bundles_post_ra>
